<compile_context>
chip_gen: v7x
topology: tpu7x:2x2x1
jax: 0.10.0
libtpu: 0.0.40
codegen_flags: <defaults>
</compile_context>

<pallas_src>
import jax
import jax.numpy as jnp
from jax.experimental import pallas as pl
from jax.experimental.pallas import tpu as pltpu


def _round_up(x, m):
    return ((x + m - 1) // m) * m


def _decoder_mlp_kernel(h1rep_ref, coord_ref, w1c_ref,
                        w2_ref, b2_ref, w3_ref, b3_ref,
                        w4_ref, b4_ref, o_ref):
    """One (batch row, target tile): layer-1 coord term + 3 MXU matmuls."""
    h1_rep = h1rep_ref[0]                       # (1, 128)      f32
    coord = coord_ref[0]                        # (t_tile, 1)   f32

    # Layer 1: hoisted rep-term + per-target coord term, relu (f32, VPU).
    h = jnp.maximum(h1_rep + coord * w1c_ref[...], 0.0)        # (t_tile, 128)

    # Layers 2-4: bf16 MXU operands, f32 accumulation.
    h = jnp.dot(h.astype(jnp.bfloat16), w2_ref[...],
                preferred_element_type=jnp.float32) + b2_ref[...]
    h = jnp.maximum(h, 0.0)

    h = jnp.dot(h.astype(jnp.bfloat16), w3_ref[...],
                preferred_element_type=jnp.float32) + b3_ref[...]
    h = jnp.maximum(h, 0.0)

    out = jnp.dot(h.astype(jnp.bfloat16), w4_ref[...],          # padded to 128
                  preferred_element_type=jnp.float32) + b4_ref[...]
    o_ref[...] = out[None].astype(o_ref.dtype)                   # (1, t_tile, 128)


def decoder_forward(representations, target_x, params, *, row_tile=512):
    """Pallas implementation of Decoder.forward.

    representations: (B, 128) float32
    target_x:        (B, T, 1) float32
    returns:         (B, T, 2) float32
    """
    w1, b1, w2, b2, w3, b3, w4, b4 = params
    B, T, dim_pred = target_x.shape
    rep_dim = representations.shape[-1]
    hid = w2.shape[0]
    out_dim = w4.shape[-1]
    assert dim_pred == 1 and rep_dim == 128 and hid == 128

    # ---- plain-XLA glue / hoisting ----------------------------------------
    w1_rep = w1[:rep_dim]                                  # (128, 128)
    w1_coord = w1[rep_dim:]                                # (1, 128)
    # Hoist: computed once per batch row instead of once per (batch, target).
    h1_rep = (representations @ w1_rep + b1)[:, None, :]   # (B, 1, 128) f32

    # Target-axis tile: big (multiple of 256 preferred) but no larger than T.
    t_tile = min(int(row_tile), _round_up(T, 8))
    T_pad = _round_up(T, t_tile)
    coord = jnp.pad(target_x, ((0, 0), (0, T_pad - T), (0, 0)))  # (B, T_pad, 1)

    # Pad the 2-wide head to 128 lanes -> lane-dense, unmasked output stores.
    w4_pad = jnp.zeros((hid, 128), w4.dtype).at[:, :out_dim].set(w4)
    b4_pad = jnp.zeros((1, 128), b4.dtype).at[:, :out_dim].set(b4)

    # bf16 MXU operands (accumulation stays f32 inside the kernel).
    w2_bf = w2.astype(jnp.bfloat16)
    w3_bf = w3.astype(jnp.bfloat16)
    w4_bf = w4_pad.astype(jnp.bfloat16)

    grid = (B, T_pad // t_tile)
    const = lambda b, t: (0, 0)   # weights/biases resident, never re-DMAed

    n_rows = B * T_pad
    cost = pl.CostEstimate(
        flops=n_rows * (2 * hid + 3 * 2 * hid * 128),
        transcendentals=0,
        bytes_accessed=(B * 128 * 4                      # h1_rep
                        + B * T_pad * 4                  # coord
                        + 3 * hid * 128 * 2              # bf16 weights
                        + 4 * 128 * 4                    # biases + w1_coord
                        + B * T_pad * 128 * 4),          # lane-dense output
    )

    out = pl.pallas_call(
        _decoder_mlp_kernel,
        out_shape=jax.ShapeDtypeStruct((B, T_pad, 128), jnp.float32),
        grid_spec=pltpu.PrefetchScalarGridSpec(
            num_scalar_prefetch=0,
            grid=grid,
            in_specs=[
                pl.BlockSpec((1, 1, 128), lambda b, t: (b, 0, 0)),      # h1_rep
                pl.BlockSpec((1, t_tile, 1), lambda b, t: (b, t, 0)),   # coord
                pl.BlockSpec((1, 128), const),                          # w1_coord
                pl.BlockSpec((hid, 128), const),                        # w2 (bf16)
                pl.BlockSpec((1, 128), const),                          # b2
                pl.BlockSpec((hid, 128), const),                        # w3 (bf16)
                pl.BlockSpec((1, 128), const),                          # b3
                pl.BlockSpec((hid, 128), const),                        # w4 padded (bf16)
                pl.BlockSpec((1, 128), const),                          # b4 padded
            ],
            out_specs=pl.BlockSpec((1, t_tile, 128), lambda b, t: (b, t, 0)),
        ),
        compiler_params=pltpu.CompilerParams(
            # No reduction axis: both grid axes independent -> megacore shards.
            dimension_semantics=("parallel", "parallel"),
            # Explicit budget (usage at t_tile=512 is ~1.5 MiB; safe on v7x's
            # smaller 64 MiB physical VMEM as well as v5e/v6e).
            vmem_limit_bytes=32 * 1024 * 1024,
        ),
        cost_estimate=cost,
    )(h1_rep, coord, w1_coord, w2_bf, b2, w3_bf, b3, w4_bf, b4_pad)

    # Drop target padding and the padded output lanes.
    return out[:, :T, :out_dim]


def init_params(key):
    """Deterministic synthetic weights matching nn.Linear shapes.

    Weights are stored transposed vs PyTorch (in_features, out_features) so the
    kernel computes x @ W + b directly.
    """
    ks = jax.random.split(key, 8)

    def lin(kw, kb, fan_in, fan_out):
        bound = 1.0 / (fan_in ** 0.5)
        w = jax.random.uniform(kw, (fan_in, fan_out), jnp.float32, -bound, bound)
        b = jax.random.uniform(kb, (1, fan_out), jnp.float32, -bound, bound)
        return w, b

    w1, b1 = lin(ks[0], ks[1], 129, 128)
    w2, b2 = lin(ks[2], ks[3], 128, 128)
    w3, b3 = lin(ks[4], ks[5], 128, 128)
    w4, b4 = lin(ks[6], ks[7], 128, 2)
    return (w1, b1, w2, b2, w3, b3, w4, b4)


def decoder_ref(representations, target_x, params):
    """Pure-JAX f32 reference matching the PyTorch module semantics."""
    w1, b1, w2, b2, w3, b3, w4, b4 = params
    B, T, _ = target_x.shape
    rep = jnp.broadcast_to(representations[:, None, :], (B, T, 128))
    x = jnp.concatenate([rep, target_x], axis=-1).reshape(B * T, 129)
    x = jnp.maximum(x @ w1 + b1, 0.0)
    x = jnp.maximum(x @ w2 + b2, 0.0)
    x = jnp.maximum(x @ w3 + b3, 0.0)
    x = x @ w4 + b4
    return x.reshape(B, T, 2)


if __name__ == "__main__":
    key = jax.random.PRNGKey(0)
    k_rep, k_tx, k_par = jax.random.split(key, 3)

    B, T, dim_pred = 2, 8, 1
    representations = jax.random.normal(k_rep, (B, 128), jnp.float32)
    target_x = jax.random.normal(k_tx, (B, T, dim_pred), jnp.float32)
    params = init_params(k_par)

    out = decoder_forward(representations, target_x, params)
    out = jax.block_until_ready(out)

    ref = decoder_ref(representations, target_x, params)
    assert out.shape == (B, T, 2), out.shape
    # bf16 MXU operands (f32 accumulation) vs the pure-f32 reference -> looser
    # tolerance than an all-f32 comparison.
    err = float(jnp.max(jnp.abs(out - ref)))
    assert jnp.allclose(out, ref, atol=2e-2, rtol=2e-2), err

    # TODO(synk): the original forward returns undefined name `xq` (a typo);
    # we return the computed `x` as clearly intended.
    print("KERNEL_OK")
</pallas_src>

<mosaic_0001>
module attributes {stable_mosaic.version = 11 : i64} {
  func.func @_decoder_mlp_kernel(%arg0: i32, %arg1: i32, %arg2: memref<1x1x128xf32, #tpu.memory_space<vmem>>, %arg3: memref<1x8x1xf32, #tpu.memory_space<vmem>>, %arg4: memref<1x128xf32, #tpu.memory_space<vmem>>, %arg5: memref<128x128xbf16, #tpu.memory_space<vmem>>, %arg6: memref<1x128xf32, #tpu.memory_space<vmem>>, %arg7: memref<128x128xbf16, #tpu.memory_space<vmem>>, %arg8: memref<1x128xf32, #tpu.memory_space<vmem>>, %arg9: memref<128x128xbf16, #tpu.memory_space<vmem>>, %arg10: memref<1x128xf32, #tpu.memory_space<vmem>>, %arg11: memref<1x8x128xf32, #tpu.memory_space<vmem>>) attributes {dimension_semantics = [#tpu.dimension_semantics<parallel>, #tpu.dimension_semantics<parallel>], iteration_bounds = array<i64: 2, 1>, scalar_prefetch = 0 : i64, scratch_operands = 0 : i64, tpu.core_type = #tpu.core_type<tc>, window_params = [{transform_indices = @transform_0, window_bounds = array<i64: 1, 1, 128>}, {transform_indices = @transform_1, window_bounds = array<i64: 1, 8, 1>}, {pipeline_mode = #tpu.pipeline_mode<synchronous>, transform_indices = @transform_2, window_bounds = array<i64: 1, 128>}, {pipeline_mode = #tpu.pipeline_mode<synchronous>, transform_indices = @transform_3, window_bounds = array<i64: 128, 128>}, {pipeline_mode = #tpu.pipeline_mode<synchronous>, transform_indices = @transform_4, window_bounds = array<i64: 1, 128>}, {pipeline_mode = #tpu.pipeline_mode<synchronous>, transform_indices = @transform_5, window_bounds = array<i64: 128, 128>}, {pipeline_mode = #tpu.pipeline_mode<synchronous>, transform_indices = @transform_6, window_bounds = array<i64: 1, 128>}, {pipeline_mode = #tpu.pipeline_mode<synchronous>, transform_indices = @transform_7, window_bounds = array<i64: 128, 128>}, {pipeline_mode = #tpu.pipeline_mode<synchronous>, transform_indices = @transform_8, window_bounds = array<i64: 1, 128>}, {transform_indices = @transform_9, window_bounds = array<i64: 1, 8, 128>}]} {
    %c0 = arith.constant 0 : index
    %c0_0 = arith.constant 0 : index
    %c0_1 = arith.constant 0 : index
    %0 = vector.load %arg2[%c0, %c0_0, %c0_1] : memref<1x1x128xf32, #tpu.memory_space<vmem>>, vector<1x1x128xf32>
    %1 = vector.shape_cast %0 : vector<1x1x128xf32> to vector<1x128xf32>
    %c0_2 = arith.constant 0 : index
    %c0_3 = arith.constant 0 : index
    %c0_4 = arith.constant 0 : index
    %2 = vector.load %arg3[%c0_2, %c0_3, %c0_4] : memref<1x8x1xf32, #tpu.memory_space<vmem>>, vector<1x8x1xf32>
    %3 = vector.shape_cast %2 : vector<1x8x1xf32> to vector<8x1xf32>
    %c0_5 = arith.constant 0 : index
    %c0_6 = arith.constant 0 : index
    %4 = vector.load %arg4[%c0_5, %c0_6] : memref<1x128xf32, #tpu.memory_space<vmem>>, vector<1x128xf32>
    %5 = vector.broadcast %3 : vector<8x1xf32> to vector<8x128xf32>
    %6 = vector.broadcast %4 : vector<1x128xf32> to vector<8x128xf32>
    %7 = arith.mulf %5, %6 : vector<8x128xf32>
    %8 = vector.broadcast %1 : vector<1x128xf32> to vector<8x128xf32>
    %9 = arith.addf %8, %7 : vector<8x128xf32>
    %cst = arith.constant 0.000000e+00 : f32
    %10 = vector.broadcast %cst : f32 to vector<8x128xf32>
    %11 = arith.maximumf %9, %10 : vector<8x128xf32>
    %12 = arith.truncf %11 : vector<8x128xf32> to vector<8x128xbf16>
    %c0_7 = arith.constant 0 : index
    %c0_8 = arith.constant 0 : index
    %13 = vector.load %arg5[%c0_7, %c0_8] : memref<128x128xbf16, #tpu.memory_space<vmem>>, vector<128x128xbf16>
    %cst_9 = arith.constant dense<0.000000e+00> : vector<8x128xf32>
    %14 = tpu.matmul %12, %13, %cst_9 {dimension_numbers = #tpu.dot_dimension_numbers<[1], [0], [0], [1], [0, 0, 1, 1], [], []>} : vector<8x128xbf16>, vector<128x128xbf16>, vector<8x128xf32> -> vector<8x128xf32>
    %c0_10 = arith.constant 0 : index
    %c0_11 = arith.constant 0 : index
    %15 = vector.load %arg6[%c0_10, %c0_11] : memref<1x128xf32, #tpu.memory_space<vmem>>, vector<1x128xf32>
    %16 = vector.broadcast %15 : vector<1x128xf32> to vector<8x128xf32>
    %17 = arith.addf %14, %16 : vector<8x128xf32>
    %cst_12 = arith.constant 0.000000e+00 : f32
    %18 = vector.broadcast %cst_12 : f32 to vector<8x128xf32>
    %19 = arith.maximumf %17, %18 : vector<8x128xf32>
    %20 = arith.truncf %19 : vector<8x128xf32> to vector<8x128xbf16>
    %c0_13 = arith.constant 0 : index
    %c0_14 = arith.constant 0 : index
    %21 = vector.load %arg7[%c0_13, %c0_14] : memref<128x128xbf16, #tpu.memory_space<vmem>>, vector<128x128xbf16>
    %cst_15 = arith.constant dense<0.000000e+00> : vector<8x128xf32>
    %22 = tpu.matmul %20, %21, %cst_15 {dimension_numbers = #tpu.dot_dimension_numbers<[1], [0], [0], [1], [0, 0, 1, 1], [], []>} : vector<8x128xbf16>, vector<128x128xbf16>, vector<8x128xf32> -> vector<8x128xf32>
    %c0_16 = arith.constant 0 : index
    %c0_17 = arith.constant 0 : index
    %23 = vector.load %arg8[%c0_16, %c0_17] : memref<1x128xf32, #tpu.memory_space<vmem>>, vector<1x128xf32>
    %24 = vector.broadcast %23 : vector<1x128xf32> to vector<8x128xf32>
    %25 = arith.addf %22, %24 : vector<8x128xf32>
    %cst_18 = arith.constant 0.000000e+00 : f32
    %26 = vector.broadcast %cst_18 : f32 to vector<8x128xf32>
    %27 = arith.maximumf %25, %26 : vector<8x128xf32>
    %28 = arith.truncf %27 : vector<8x128xf32> to vector<8x128xbf16>
    %c0_19 = arith.constant 0 : index
    %c0_20 = arith.constant 0 : index
    %29 = vector.load %arg9[%c0_19, %c0_20] : memref<128x128xbf16, #tpu.memory_space<vmem>>, vector<128x128xbf16>
    %cst_21 = arith.constant dense<0.000000e+00> : vector<8x128xf32>
    %30 = tpu.matmul %28, %29, %cst_21 {dimension_numbers = #tpu.dot_dimension_numbers<[1], [0], [0], [1], [0, 0, 1, 1], [], []>} : vector<8x128xbf16>, vector<128x128xbf16>, vector<8x128xf32> -> vector<8x128xf32>
    %c0_22 = arith.constant 0 : index
    %c0_23 = arith.constant 0 : index
    %31 = vector.load %arg10[%c0_22, %c0_23] : memref<1x128xf32, #tpu.memory_space<vmem>>, vector<1x128xf32>
    %32 = vector.broadcast %31 : vector<1x128xf32> to vector<8x128xf32>
    %33 = arith.addf %30, %32 : vector<8x128xf32>
    %34 = vector.shape_cast %33 : vector<8x128xf32> to vector<1x8x128xf32>
    %c0_24 = arith.constant 0 : index
    %c0_25 = arith.constant 0 : index
    %c0_26 = arith.constant 0 : index
    %35 = vector.load %arg11[%c0_24, %c0_25, %c0_26] : memref<1x8x128xf32, #tpu.memory_space<vmem>>, vector<1x8x128xf32>
    tpu.vector_store %arg11[%c0_24, %c0_25, %c0_26], %34 {strides = array<i32>} : memref<1x8x128xf32, #tpu.memory_space<vmem>>, vector<1x8x128xf32>,
    return
  }
  func.func @transform_0(%arg0: i32, %arg1: i32) -> (i32, i32, i32) {
    %c0_i32 = arith.constant 0 : i32
    %c0_i32_0 = arith.constant 0 : i32
    %c0_i32_1 = arith.constant 0 : i32
    return %arg0, %c0_i32, %c0_i32_0 : i32, i32, i32
  }
  func.func @transform_1(%arg0: i32, %arg1: i32) -> (i32, i32, i32) {
    %c0_i32 = arith.constant 0 : i32
    %c0_i32_0 = arith.constant 0 : i32
    return %arg0, %arg1, %c0_i32 : i32, i32, i32
  }
  func.func @transform_2(%arg0: i32, %arg1: i32) -> (i32, i32) {
    %c0_i32 = arith.constant 0 : i32
    %c0_i32_0 = arith.constant 0 : i32
    %c0_i32_1 = arith.constant 0 : i32
    return %c0_i32, %c0_i32_0 : i32, i32
  }
  func.func @transform_3(%arg0: i32, %arg1: i32) -> (i32, i32) {
    %c0_i32 = arith.constant 0 : i32
    %c0_i32_0 = arith.constant 0 : i32
    %c0_i32_1 = arith.constant 0 : i32
    return %c0_i32, %c0_i32_0 : i32, i32
  }
  func.func @transform_4(%arg0: i32, %arg1: i32) -> (i32, i32) {
    %c0_i32 = arith.constant 0 : i32
    %c0_i32_0 = arith.constant 0 : i32
    %c0_i32_1 = arith.constant 0 : i32
    return %c0_i32, %c0_i32_0 : i32, i32
  }
  func.func @transform_5(%arg0: i32, %arg1: i32) -> (i32, i32) {
    %c0_i32 = arith.constant 0 : i32
    %c0_i32_0 = arith.constant 0 : i32
    %c0_i32_1 = arith.constant 0 : i32
    return %c0_i32, %c0_i32_0 : i32, i32
  }
  func.func @transform_6(%arg0: i32, %arg1: i32) -> (i32, i32) {
    %c0_i32 = arith.constant 0 : i32
    %c0_i32_0 = arith.constant 0 : i32
    %c0_i32_1 = arith.constant 0 : i32
    return %c0_i32, %c0_i32_0 : i32, i32
  }
  func.func @transform_7(%arg0: i32, %arg1: i32) -> (i32, i32) {
    %c0_i32 = arith.constant 0 : i32
    %c0_i32_0 = arith.constant 0 : i32
    %c0_i32_1 = arith.constant 0 : i32
    return %c0_i32, %c0_i32_0 : i32, i32
  }
  func.func @transform_8(%arg0: i32, %arg1: i32) -> (i32, i32) {
    %c0_i32 = arith.constant 0 : i32
    %c0_i32_0 = arith.constant 0 : i32
    %c0_i32_1 = arith.constant 0 : i32
    return %c0_i32, %c0_i32_0 : i32, i32
  }
  func.func @transform_9(%arg0: i32, %arg1: i32) -> (i32, i32, i32) {
    %c0_i32 = arith.constant 0 : i32
    %c0_i32_0 = arith.constant 0 : i32
    return %arg0, %arg1, %c0_i32 : i32, i32, i32
  }
}

</mosaic_0001>

<bundles_post_ra>
// kernel: tpu_custom_call.1
= control target key start
LH: loop header
LB: loop body
LE: loop exit
PB: predicated region body
PF: predicated region fallthrough
CT: control target
= control target key end

     0   :  { %s1636_s0 = inlined_call_operand.vmem [shape: f32[2,1,128], index: 0, kind: input, shape index: {}]   ;;  %s1637_s1 = inlined_call_operand.vmem [shape: f32[2,8,1], index: 1, kind: input, shape index: {}]   ;;  %s1638_s2 = inlined_call_operand.vmem [shape: f32[1,128], index: 2, kind: input, shape index: {}]   ;;  %s1639_s3 = inlined_call_operand.hbm [shape: bf16[128,128], index: 3, kind: input, shape index: {}]   ;;  %s1640_s4 = inlined_call_operand.vmem [shape: f32[1,128], index: 4, kind: input, shape index: {}]   ;;  %s1641_s5 = inlined_call_operand.hbm [shape: bf16[128,128], index: 5, kind: input, shape index: {}]   ;;  %s1642_s6 = inlined_call_operand.vmem [shape: f32[1,128], index: 6, kind: input, shape index: {}]   ;;  %s1643_s7 = inlined_call_operand.hbm [shape: bf16[128,128], index: 7, kind: input, shape index: {}]   ;;  %s1644_s8 = inlined_call_operand.vmem [shape: f32[1,128], index: 8, kind: input, shape index: {}]   ;;  %s1645_s9 = inlined_call_operand.hbm [shape: f32[2,8,128], index: 9, kind: output, shape index: {}]  }
   0x1   :  { %1655 = sst [smem:[#allocation18_spill]] %s1641_s5 }
   0x2   :  { %14 = vsyncpa [#allocation3], 0 }
   0x3   :  { %15 = vsyncpa [#allocation6], 0 }
   0x4   :  { %16 = vsyncpa [#allocation4], 0 }
   0x5   :  { %18 = vsyncpa [#allocation4 + $0x1], 0  ;;  %s1380_s30 = smov 0   ;;  %s1382_s10 = smov 0  }
   0x6   :  { %s1384_s11 = smov 0   ;;  %s1386_s12 = smov 0  }
   0x7   :  { %s1388_s13 = smov 0   ;;  %s1390_s14 = smov 0  }
   0x8 LB: > { %1656 = sst [smem:[#allocation12_spill]] %s1299_s30  ;;  %s900_s15 = sadd.s32 4294967295, %s1319_s14   ;;  %s1319_s14 = sphi %s1390_s14, %s24_s14   ;;  %s1315_s13 = sphi %s1388_s13, %s1678_s13   ;;  %s1311_s12 = sphi %s1386_s12, %s1677_s12   ;;  %s1307_s11 = sphi %s1384_s11, %s1676_s11   ;;  %s1303_s10 = sphi %s1382_s10, %s1680_s10   ;;  %s1299_s30 = sphi %s1380_s30, %s1679_s30  }
   0x9   : > { %1657 = sst [smem:[#allocation13_spill]] %s1307_s11  ;;  %s901_s16 = sadd.s32 4294967294, %s1319_s14  }
   0xa   : > { %1658 = sst [smem:[#allocation14_spill]] %s1315_s13  ;;  %s36_s17 = sadd.s32 1, %s1315_s13 }
   0xb   : > { %s246_s18 = sadd.s32 1, %s1307_s11  ;;  %p38_p0 = scmp.ge.s32.totalorder %s36_s17, 2 }
   0xc   : > { %p256_p1 = scmp.ne.s32.totalorder %s1307_s11, %s1303_s10  ;;  %p257_p2 = scmp.eq.s32.totalorder %s900_s15, 1 }
   0xd   : > { %p262_p3 = scmp.ne.s32.totalorder %s1303_s10, %s1299_s30  ;;  %s1682_s17 = smov (%p38_p0, %s36_s17), 0 }
   0xe   : > { %1659 = sst [smem:[#allocation15_spill]] %s1682_s17  ;;  %p1420_p4 = por %p257_p2, %p256_p1 }
   0xf   : > { %p263_p5 = scmp.eq.s32.totalorder %s901_s16, 1  ;;  %s241_s20 = ssub.s32 %s1315_s13, %s1682_s17 }
  0x10   : > { %s1660_s19 = scalar_select %p1420_p4, 1, 0 }
  0x11   : > { %p902_p6 = scmp.ge.s32.totalorder %s1319_s14, 1  ;;  %p244_p7 = scmp.eq.s32.totalorder %s241_s20, 0 }
  0x12   : > { %p1427_p8 = por %p263_p5, %p262_p3  ;;  %p270_p9 = scmp.lt.s32.totalorder %s1319_s14, 3 }
  0x13   : > { %s1433_s22 = scalar_select %p244_p7, %s1307_s11, %s246_s18  }
  0x14   : > { %s1661_s21 = scalar_select %p1427_p8, 1, 0 }
  0x15   : > { %1663 = sst [smem:[#allocation17_spill]] %s1433_s22  ;;  %p1435_p10 = pnand %p902_p6, %p270_p9 }
  0x16   : > { %1662 = sst [smem:[#allocation16_spill]] %s1661_s21  ;;  %p1439_p11 = scmp.eq.s32.totalorder %s900_s15, 0 }
  0x17   : > { %s1664_s23 = scalar_select %p1435_p10, 1, 0 }
  0x18   : > { %s1665_s24 = scalar_select %p1439_p11, 1, 0 }
  0x19   : > { %p1047_p12 = pneg %p1435_p10  ;;  %s1321_s25 = smov [#allocation5]  }
  0x1a   : > { %s301_s26 = sshll.u32 %s1321_s25, 4  ;;  %s1322_s28 = smov [#allocation2]   ;;  %s302_s26 = int_to_ptr.vmem [resolvable:$true] %s301_s26 }
  0x1b   : > { %p1447_p13 = pnand %p1439_p11, %p1047_p12  ;;  %s285_s29 = sshll.u32 %s1322_s28, 4  ;;  %s286_s29 = int_to_ptr.vmem [resolvable:$true] %s285_s29 }
  0x1c   : > { %s1667_s5 = sld [smem:[#allocation18_spill]] }
  0x1d   : > { %p1459_p1 = pneg %p1447_p13 }
  0x22   : > { %s1149_s15 = scalar_lea.hbm %s1667_s5, 1024 }
  0x23   : > { %p1150_p0 = scmp.ne.s32.totalorder %s1667_s5, %s1149_s15  ;;  %p1156_p5 = scmp.lt.u32.totalorder %s1149_s15, %s1667_s5 }
  0x25   : > { %p1152_p2 = pnand %p1459_p1, %p1150_p0 }
  0x27   : > { %p1153_p3 = pneg %p1152_p2 }
  0x29   : > { %p1158_p6 = pnand %p1156_p5, %p1153_p3 }
  0x2b   : > { %1161 = shalt.err (!%p1158_p6)
}
  0x2c   : > { %s1162_s28 = scalar_lea.vmem %s302_s26, 1024  ;;  %p1170_p8 = scmp.lt.s32.totalorder %s302_s26, %s302_s26 }
  0x2d   : > { %p1163_p7 = scmp.ne.s32.totalorder %s302_s26, %s1162_s28  ;;  %p1171_p4 = scmp.lt.s32.totalorder %s1162_s28, %s1162_s28 }
  0x2f   : > { %p1165_p9 = pnand %p1163_p7, %p1459_p1  ;;  %p1172_p11 = por %p1171_p4, %p1170_p8 }
  0x31   : > { %p1166_p12 = pneg %p1165_p9 }
  0x33   : > { %p1173_p10 = pnand %p1172_p11, %p1166_p12 }
  0x35   : > { %1176 = shalt.err (!%p1173_p10)
}
  0x36   : > { %s1323_s17 = smov 64   ;;  %s1324_s16 = smov 4  }
  0x37   : > { %1053 = dma.hbm_to_vmem [thread:$0]  (!%p1447_p13), %s1667_s5, 1024, %s302_s26, [#allocation6], %s1323_s17, %s1323_s17, %s1324_s16  }
  0x38   : > { %s1177_s20 = scalar_lea.hbm %s1639_s3, 1024 }
  0x39   : > { %p1178_p4 = scmp.ne.s32.totalorder %s1639_s3, %s1177_s20  ;;  %p1184_p11 = scmp.lt.u32.totalorder %s1177_s20, %s1639_s3 }
  0x3b   : > { %p1180_p8 = pnand %p1178_p4, %p1459_p1 }
  0x3d   : > { %p1181_p10 = pneg %p1180_p8 }
  0x3f   : > { %p1186_p0 = pnand %p1184_p11, %p1181_p10 }
  0x41   : > { %1189 = shalt.err (!%p1186_p0)
}
  0x42   : > { %s1190_s13 = scalar_lea.vmem %s286_s29, 1024  ;;  %p1198_p6 = scmp.lt.s32.totalorder %s286_s29, %s286_s29 }
  0x43   : > { %p1191_p2 = scmp.ne.s32.totalorder %s286_s29, %s1190_s13  ;;  %p1199_p7 = scmp.lt.s32.totalorder %s1190_s13, %s1190_s13 }
  0x45   : > { %p1193_p3 = pnand %p1191_p2, %p1459_p1  ;;  %p1200_p9 = por %p1199_p7, %p1198_p6 }
  0x47   : > { %p1194_p5 = pneg %p1193_p3 }
  0x49   : > { %p1201_p12 = pnand %p1200_p9, %p1194_p5 }
  0x4b   : > { %1204 = shalt.err (!%p1201_p12)
}
  0x4c   : > { %1050 = dma.hbm_to_vmem [thread:$0]  (!%p1447_p13), %s1639_s3, 1024, %s286_s29, [#allocation3], %s1323_s17, %s1323_s17, %s1324_s16  }
  0x4d   : > { %s1325_s21 = smov [#allocation7]   ;;  %s1205_s15 = scalar_lea.hbm %s1643_s7, 1024 }
  0x4e   : > { %s317_s26 = sshll.u32 %s1325_s21, 4  ;;  %p1206_p4 = scmp.ne.s32.totalorder %s1643_s7, %s1205_s15  ;;  %s318_s26 = int_to_ptr.vmem [resolvable:$true] %s317_s26 }
  0x4f   : > { %p1212_p11 = scmp.lt.u32.totalorder %s1205_s15, %s1643_s7 }
  0x50   : > { %p1208_p8 = pnand %p1206_p4, %p1459_p1 }
  0x52   : > { %p1209_p10 = pneg %p1208_p8 }
  0x54   : > { %p1214_p0 = pnand %p1212_p11, %p1209_p10 }
  0x56   : > { %1217 = shalt.err (!%p1214_p0)
}
  0x57   : > { %s1218_s29 = scalar_lea.vmem %s318_s26, 1024  ;;  %p1226_p6 = scmp.lt.s32.totalorder %s318_s26, %s318_s26 }
  0x58   : > { %p1219_p2 = scmp.ne.s32.totalorder %s318_s26, %s1218_s29  ;;  %p1227_p7 = scmp.lt.s32.totalorder %s1218_s29, %s1218_s29 }
  0x5a   : > { %p1221_p3 = pnand %p1219_p2, %p1459_p1  ;;  %p1228_p9 = por %p1227_p7, %p1226_p6 }
  0x5c   : > { %p1222_p5 = pneg %p1221_p3 }
  0x5e   : > { %p1229_p12 = pnand %p1228_p9, %p1222_p5 }
  0x60   : > { %1232 = shalt.err (!%p1229_p12)
}
  0x61   : > { %1056 = dma.hbm_to_vmem [thread:$0]  (!%p1447_p13), %s1643_s7, 1024, %s318_s26, [#allocation6], %s1323_s17, %s1323_s17, %s1324_s16  }
  0x62   : > { %p1669_p4 = scmp.ne.s32.totalorder %s1664_s23, 0 }
  0x63   : > { %p1670_p1 = scmp.ne.s32.totalorder (!%p1669_p4), %s1665_s24, 0 }
  0x64   : > { %352 = sbr.rel (%p1669_p4) target bundleno = 917 (0x395), region = 56 }
  0x6b   : > { %1286 = dma.done.wait (%p1670_p1), [#allocation3], 1024  }
  0x6c   : > { %1288 = vsyncadd (%p1670_p1), [#allocation3], 4294966272 }
  0x6d   : > { %1290 = dma.done.wait (%p1670_p1), [#allocation6], 2048  }
  0x6e   : > { %1292 = vsyncadd (%p1670_p1), [#allocation6], 4294965248  ;;  %p401_p8 = scmp.lt.s32.totalorder %s1311_s12, 1  ;;  %v1326_v0 = vmov 0   ;;  %v1327_v1 = vmov 0.0   ;;  %v1125_v3 = vld [vmem:[#allocation2] sm:$0xff]  }
  0x6f   : > { %1124 = vset.pattern.permute.xlu0 %v1326_v0  ;;  %973 = vmatprep.subr.bf16.mxu0 %v1327_v1  ;;  %v1126_v4 = vld [vmem:[#allocation2 + $0x8] sm:$0xff]   ;;  %v1127_v5 = vld [vmem:[#allocation2 + $0x10] sm:$0xff]   ;;  %vm1328_vm0 = vmmov 0   ;;  %v1133_v6 = vld [vmem:[#allocation5] sm:$0xff]   ;;  %s398_s13 = sand.u32 1, %s1303_s10   ;;  %p1671_p10 = scmp.ne.s32.totalorder %s1660_s19, 0 }
  0x70   : > { %s1533_s23 = scalar_select %p401_p8, %s1311_s12, 1  ;;  %993 = vmatprep.subr.bf16.mxu1 %v1327_v1  ;;  %974 = vmatpush3.bf16.msra.mxu0 %v1125_v3  ;;  %v1128_v7 = vld [vmem:[#allocation2 + $0x18] sm:$0xff]   ;;  %v1134_v8 = vld [vmem:[#allocation5 + $0x8] sm:$0xff]   ;;  %v1129_v9 = vld [vmem:[#allocation2 + $0x20] sm:$0xff]  }
  0x71   : > { %975 = vmatprep.subr.bf16.mxu0 %v1327_v1  ;;  %989 = vmatprep.mubr.msk.bf16.mxu0 %vm1328_vm0, %v1327_v1  ;;  %v1135_v10 = vld [vmem:[#allocation5 + $0x10] sm:$0xff]   ;;  %v1130_v11 = vld [vmem:[#allocation2 + $0x28] sm:$0xff]   ;;  %v1136_v12 = vld [vmem:[#allocation5 + $0x18] sm:$0xff]   ;;  %s911_s29 = sshll.u32 %s398_s13, 3  ;;  %s775_s11 = scalar_lea.sflag [#allocation4], %s398_s13 }
  0x72   : > { %s912_s27 = sshll.u32 %s1533_s23, 3  ;;  %1009 = vmatprep.mubr.msk.bf16.mxu1 %vm1328_vm0, %v1327_v1  ;;  %994 = vmatpush3.bf16.msra.mxu1 %v1133_v6  ;;  %v1131_v13 = vld [vmem:[#allocation2 + $0x30] sm:$0xff]   ;;  %v1137_v14 = vld [vmem:[#allocation5 + $0x20] sm:$0xff]   ;;  %v1132_v15 = vld [vmem:[#allocation2 + $0x38] sm:$0xff]   ;;  %s403_s21 = scalar_lea.vmem %s1636_s0, %s1533_s23 }
  0x73   : > { %s410_s16 = scalar_lea.vmem %s1637_s1, %s912_s27  ;;  %995 = vmatprep.subr.bf16.mxu1 %v1327_v1  ;;  %v1138_v16 = vld [vmem:[#allocation5 + $0x28] sm:$0xff]   ;;  %v913_v17 = vld [vmem:[%s1638_s2] ss:$0 sm:$0xff]  ;;  %v1139_v24 = vld [vmem:[#allocation5 + $0x30] sm:$0xff]   ;;  %s943_s23 = sshll.u32 %s1311_s12, 7 }
  0x74   : > { %v413_v2 = vld [vmem:[%s410_s16] sm:$0xff]  ;;  %976 = vmatpush3.bf16.msra.mxu0 %v1126_v4  ;;  %v1140_v25 = vld [vmem:[#allocation5 + $0x38] sm:$0xff]   ;;  %v1142_v27 = vld [vmem:[#allocation7 + $0x8] sm:$0xff]   ;;  %s400_s27 = scalar_lea.vmem [#allocation8], %s911_s29  ;;  %s1589_s24 = scalar_lea.hbm %s1645_s9, %s943_s23 }
  0x75   : > { %417 = vperm.xlu0 %1124, %v413_v2   ;;  %977 = vmatprep.subr.bf16.mxu0 %v1327_v1  ;;  %v914_v19 = vld [vmem:[%s403_s21] ss:$0 sm:$0xff]  ;;  %v1143_v28 = vld [vmem:[#allocation7 + $0x10] sm:$0xff]   ;;  %v1144_v29 = vld [vmem:[#allocation7 + $0x18] sm:$0xff]   ;;  %s789_s25 = sshll.u32 %s400_s27, 4  ;;  %s1329_s21 = smov [#allocation8]   ;;  %s1591_s25 = int_to_ptr.vmem [resolvable:$true] %s789_s25 }
  0x76   : > { %996 = vmatpush3.bf16.msra.mxu1 %v1134_v8  ;;  %v1141_v26 = vld [vmem:[#allocation7] sm:$0xff]   ;;  %v1146_v31 = vld [vmem:[#allocation7 + $0x28] sm:$0xff]   ;;  %v1147_v40 = vld [vmem:[#allocation7 + $0x30] sm:$0xff]   ;;  %s1233_s12 = scalar_lea.vmem %s1591_s25, 128  ;;  %s1237_s26 = sshll.u32 %s1329_s21, 4  ;;  %s1238_s26 = int_to_ptr.vmem [resolvable:$false] %s1237_s26 }
  0x77   : > { %997 = vmatprep.subr.bf16.mxu1 %v1327_v1  ;;  %v1145_v30 = vld [vmem:[#allocation7 + $0x20] sm:$0xff]   ;;  %v1148_v41 = vld [vmem:[#allocation7 + $0x38] sm:$0xff]   ;;  %p1234_p13 = scmp.ne.s32.totalorder %s1591_s25, %s1233_s12  ;;  %s1239_s22 = scalar_lea.vmem %s1238_s26, 256 }
  0x78   : > { %978 = vmatpush3.bf16.msra.mxu0 %v1127_v5  ;;  %v915_v32 = vld [vmem:[%s1640_s4] ss:$0 sm:$0xff]  ;;  %p1240_p2 = scmp.lt.s32.totalorder %s1591_s25, %s1238_s26  ;;  %p1241_p3 = scmp.lt.s32.totalorder %s1239_s22, %s1233_s12 }
  0x79   : > { %979 = vmatprep.subr.bf16.mxu0 %v1327_v1  ;;  %v924_v42 = vld [vmem:[%s1642_s6] ss:$0 sm:$0xff]  ;;  %p1235_p11 = pnand %p1234_p13, %p1671_p10 }
  0x7a   : > { %998 = vmatpush3.bf16.msra.mxu1 %v1135_v10  ;;  %v933_v50 = vld [vmem:[%s1644_s8] ss:$0 sm:$0xff]  ;;  %p1242_p5 = por %p1241_p3, %p1240_p2 }
  0x7b   : > { %999 = vmatprep.subr.bf16.mxu1 %v1327_v1  ;;  %p1236_p0 = pneg %p1235_p11 }
  0x7c   : > { %980 = vmatpush3.bf16.msra.mxu0 %v1128_v7 }
  0x7d   : > { %981 = vmatprep.subr.bf16.mxu0 %v1327_v1  ;;  %p1243_p6 = pnand %p1242_p5, %p1236_p0 }
  0x7e   : > { %1000 = vmatpush3.bf16.msra.mxu1 %v1136_v12 }
  0x7f   : > { %1001 = vmatprep.subr.bf16.mxu1 %v1327_v1 }
  0x80   : > { %982 = vmatpush3.bf16.msra.mxu0 %v1129_v9 }
  0x81   : > { %983 = vmatprep.subr.bf16.mxu0 %v1327_v1 }
  0x82   : > { %1002 = vmatpush3.bf16.msra.mxu1 %v1137_v14 }
  0x83   : > { %1003 = vmatprep.subr.bf16.mxu1 %v1327_v1 }
  0x84   : > { %984 = vmatpush3.bf16.msra.mxu0 %v1130_v11 }
  0x85   : > { %985 = vmatprep.subr.bf16.mxu0 %v1327_v1 }
  0x86   : > { %1004 = vmatpush3.bf16.msra.mxu1 %v1138_v16 }
  0x87   : > { %1005 = vmatprep.subr.bf16.mxu1 %v1327_v1 }
  0x88   : > { %986 = vmatpush3.bf16.msra.mxu0 %v1131_v13 }
  0x89   : > { %987 = vmatprep.subr.bf16.mxu0 %v1327_v1 }
  0x8a   : > { %1006 = vmatpush3.bf16.msra.mxu1 %v1139_v24 }
  0x8b   : > { %1007 = vmatprep.subr.bf16.mxu1 %v1327_v1 }
  0x8c   : > { %988 = vmatpush3.bf16.msra.mxu0 %v1132_v15 }
  0x8d   : > { %1013 = vmatprep.subr.bf16.mxu0 %v1327_v1 }
  0x8e   : > { %1008 = vmatpush3.bf16.msra.mxu1 %v1140_v25 }
  0xf4   : > { %v418_v18 = vpop.permute.xlu0 %417 }
  0xf5   : > { %v426_v20 = vmul.f32 %v913_v17, %v418_v18 }
  0xf7   : > { %v433_v21 = vadd.f32 %v914_v19, %v426_v20 }
  0xf9   : > { %v434_v22 = vmax.f32 %v433_v21, 0.0 }
  0xfb   : > { %v435_v23 = vpack.c.bf16 %v434_v22, %v434_v22 }
  0xfd   : > { %990 = vmatmul.mubr.bf16.vlgmr.msra.gmra.mrb[0].mxu0 %v435_v23 }
  0xfe   : > { %1029 = vmatprep.mubr.msk.bf16.mxu0 %vm1328_vm0, %v1327_v1  ;;  %1014 = vmatpush3.bf16.msra.mxu0 %v1141_v26 }
  0xff   : > { %1015 = vmatprep.subr.bf16.mxu0 %v1327_v1 }
 0x102   : > { %1016 = vmatpush3.bf16.msra.mxu0 %v1142_v27 }
 0x103   : > { %1017 = vmatprep.subr.bf16.mxu0 %v1327_v1 }
 0x106   : > { %1018 = vmatpush3.bf16.msra.mxu0 %v1143_v28 }
 0x107   : > { %1019 = vmatprep.subr.bf16.mxu0 %v1327_v1 }
 0x10a   : > { %1020 = vmatpush3.bf16.msra.mxu0 %v1144_v29 }
 0x10b   : > { %1021 = vmatprep.subr.bf16.mxu0 %v1327_v1 }
 0x10e   : > { %1022 = vmatpush3.bf16.msra.mxu0 %v1145_v30 }
 0x10f   : > { %1023 = vmatprep.subr.bf16.mxu0 %v1327_v1 }
 0x112   : > { %1024 = vmatpush3.bf16.msra.mxu0 %v1146_v31 }
 0x113   : > { %1025 = vmatprep.subr.bf16.mxu0 %v1327_v1 }
 0x116   : > { %1026 = vmatpush3.bf16.msra.mxu0 %v1147_v40 }
 0x117   : > { %1027 = vmatprep.subr.bf16.mxu0 %v1327_v1 }
 0x11a   : > { %1028 = vmatpush3.bf16.msra.mxu0 %v1148_v41 }
 0x1d0   : > { %v541_v33 = vpop.f32.mrb[0].mxu0 }
 0x1d1   : > { %v542_v34 = vadd.f32 %v915_v32, %v541_v33  ;;  %v991_v35 = vpop.f32.mrb[1].mxu0 }
 0x1d2   : > { %v544_v36 = vpop.f32.mrb[2].mxu0 }
 0x1d3   : > { %v547_v37 = vmax.f32 %v542_v34, 0.0  ;;  %v992_v38 = vpop.f32.mrb[3].mxu0 }
 0x1d5   : > { %v548_v39 = vpack.c.bf16 %v547_v37, %v547_v37 }
 0x1d7   : > { %1010 = vmatmul.mubr.bf16.vlgmr.msra.gmra.mrb[0].mxu1 %v548_v39 }
 0x2aa   : > { %v654_v43 = vpop.f32.mrb[0].mxu1 }
 0x2ab   : > { %v655_v44 = vadd.f32 %v924_v42, %v654_v43  ;;  %v1011_v45 = vpop.f32.mrb[1].mxu1 }
 0x2ac   : > { %v657_v46 = vpop.f32.mrb[2].mxu1 }
 0x2ad   : > { %v660_v47 = vmax.f32 %v655_v44, 0.0  ;;  %v1012_v48 = vpop.f32.mrb[3].mxu1 }
 0x2af   : > { %v661_v49 = vpack.c.bf16 %v660_v47, %v660_v47 }
 0x2b1   : > { %1030 = vmatmul.mubr.bf16.vlgmr.msra.gmra.mrb[4].mxu0 %v661_v49 }
 0x384   : > { %v767_v51 = vpop.f32.mrb[4].mxu0 }
 0x385   : > { %v768_v52 = vadd.f32 %v933_v50, %v767_v51  ;;  %v1031_v53 = vpop.f32.mrb[5].mxu0 }
 0x386   : > { %v770_v54 = vpop.f32.mrb[6].mxu0 }
 0x387   : > { %773 = vst [vmem:[%s400_s27] sm:$0xff] %v768_v52  ;;  %v1032_v55 = vpop.f32.mrb[7].mxu0 }
 0x388   : > { %1246 = shalt.err (!%p1243_p6)
}
 0x389   : > { %s1247_s18 = scalar_lea.hbm %s1589_s24, 128  ;;  %s1251_s28 = scalar_lea.hbm %s1645_s9, 256 }
 0x38a   : > { %p1248_p7 = scmp.ne.s32.totalorder %s1589_s24, %s1247_s18  ;;  %p1252_p4 = scmp.lt.u32.totalorder %s1589_s24, %s1645_s9 }
 0x38b   : > { %p1253_p1 = scmp.lt.u32.totalorder %s1251_s28, %s1247_s18  ;;  %p1255_p13 = scmp.lt.u32.totalorder %s1247_s18, %s1589_s24 }
 0x38c   : > { %p1249_p9 = pnand %p1248_p7, %p1671_p10 }
 0x38d   : > { %p1254_p8 = por %p1253_p1, %p1252_p4 }
 0x38e   : > { %p1250_p12 = pneg %p1249_p9 }
 0x38f   : > { %p1256_p11 = por %p1255_p13, %p1254_p8 }
 0x391   : > { %p1257_p0 = pnand %p1256_p11, %p1250_p12 }
 0x393   : > { %1260 = shalt.err (!%p1257_p0)
}
 0x394   : > { %1045 = dma.vmem_to_hbm [thread:$0]  (%p1671_p10), %s1591_s25, 128, %s1589_s24, %s775_s11  }
 0x395 PF: > { %s1672_s5 = sld [smem:[#allocation12_spill]]  ;;  %s1673_s30 = sld [smem:[#allocation16_spill]] }
 0x396   : > { %p1067_p2 = scmp.ge.s32.totalorder %s1319_s14, 2 }
 0x39b   : > { %s801_s23 = sand.u32 1, %s1672_s5   ;;  %p1674_p3 = scmp.ne.s32.totalorder %s1673_s30, 0 }
 0x39c   : > { %s802_s27 = scalar_lea.sflag [#allocation4], %s801_s23 }
 0x39d   : > { %p1058_p5 = pnand %p1067_p2, %p1674_p3 }
 0x39f   : > { %1294 = dma.done.wait (!%p1058_p5), %s802_s27, 128  }
 0x3a0   : > { %1296 = vsyncadd (!%p1058_p5), %s802_s27, 4294967168  ;;  %s24_s14 = sadd.s32 1, %s1319_s14   ;;  %s1675_s17 = sld [smem:[#allocation13_spill]] }
 0x3a1   : > { %p21_p6 = scmp.ge.s32.totalorder %s24_s14, 4   ;;  %s1676_s11 = sld [smem:[#allocation17_spill]] }
 0x3a2   : > { %s1677_s12 = sld [smem:[#allocation14_spill]]  ;;  %s1678_s13 = sld [smem:[#allocation15_spill]] }
 0x3a3   : > { %s1679_s30 = smov %s1303_s10  ;;  %23 = sbr.rel (!%p21_p6) target bundleno = 8 (0x8), region = 107 }
 0x3a6   : > { %s1680_s10 = smov %s1675_s17 }
 0x3aa   :  { %807 = vsyncpa [#allocation3], 1 }
 0x3ab   :  { %809 = vsyncpa [#allocation3 + $0x1], 1 }
 0x3ac   :  { %810 = vsyncpa [#allocation6], 1 }
 0x3ad   :  { %811 = vsyncpa [#allocation4], 1 }
 0x3ae   :  { %813 = vsyncpa [#allocation4 + $0x1], 1 }

</bundles_post_ra>
